<compile_context>
chip_gen: v7x
topology: tpu7x:2x2x1
jax: 0.10.0
libtpu: 0.0.40
codegen_flags: <defaults>
</compile_context>

<pallas_src>
import functools

import jax
import jax.numpy as jnp
from jax import lax
from jax.experimental import pallas as pl
from jax.experimental.pallas import tpu as pltpu


def _round_up(x, m):
    return (x + m - 1) // m * m


def _cdiv(a, b):
    return -(-a // b)


def _layer_norm_kernel(x_ref, w_ref, b_ref, o_ref, *, eps, inv_hidden):
    # x_ref : VMEM [row_block, hidden]   current tile of rows
    # w_ref : VMEM [1, hidden]           resident scale
    # b_ref : VMEM [1, hidden]           resident bias
    # o_ref : VMEM [row_block, hidden]   output tile (lane-dense, whole-tile store)
    x = x_ref[...].astype(jnp.float32)

    # Single-pass statistics: one read of x feeds both reductions, then one
    # fused normalize+affine pass writes the output.
    s1 = jnp.sum(x, axis=-1, keepdims=True)
    s2 = jnp.sum(x * x, axis=-1, keepdims=True)
    mean = s1 * inv_hidden
    var = s2 * inv_hidden - mean * mean
    var = jnp.maximum(var, 0.0)                 # guard tiny negative cancellation
    inv = lax.rsqrt(var + eps)                  # EUP rsqrt, per-row

    w = w_ref[...].astype(jnp.float32)
    b = b_ref[...].astype(jnp.float32)
    o_ref[...] = ((x - mean) * inv * w + b).astype(o_ref.dtype)


def _select_row_block(n_rows, hidden, itemsize):
    """Pick the row tile and the chip VMEM capacity (all static at trace time)."""
    # Sublane packing multiple for the dtype: 8 (f32) / 16 (bf16,f16) / 32 (i8).
    sub = max(8, 32 // max(1, itemsize))

    try:
        info = pltpu.get_tpu_info()
        vmem_cap = int(getattr(info, "vmem_capacity_bytes", 64 << 20))
    except Exception:  # pragma: no cover - conservative fallback (v7x per-TC size)
        vmem_cap = 64 << 20

    # VMEM bytes per row: 2x double-buffered input + 2x double-buffered output
    # tiles in the storage dtype, plus the f32 upcast intermediates Mosaic
    # materializes around the reductions / fused output pass.
    bytes_per_row_vmem = hidden * (4 * itemsize + 4 * 4)
    vmem_budget = int(vmem_cap * 0.70)
    rows_by_vmem = max(sub, (vmem_budget // max(1, bytes_per_row_vmem)) // sub * sub)

    # ~6 MiB of *input* bytes per tile amortizes the ~0.35us/step pipeline
    # overhead across dtypes and hidden sizes.
    target_tile_bytes = 6 << 20
    rows_by_target = max(sub, _round_up(target_tile_bytes // max(1, hidden * itemsize), sub))

    row_block = min(rows_by_target, rows_by_vmem, 1024)

    # Guarantee >= 2 grid steps when there is enough work so v7x's two
    # TensorCores both get tiles (no-op for large inputs, no-op on v5e/v6e).
    if n_rows > sub:
        row_block = min(row_block, _round_up(_cdiv(n_rows, 2), sub))

    row_block = max(row_block, sub)
    if row_block >= n_rows:
        row_block = n_rows  # full-dim block: always layout-legal, grid=(1,)
    return row_block, vmem_cap


@functools.partial(jax.jit, static_argnames=("eps",))
def lnf_forward(hidden_states, weight, bias, *, eps=1e-5):
    """Equivalent of LNFEmbeddingLayer.forward(hidden_states) = ln_f(hidden_states)."""
    orig_shape = hidden_states.shape
    hidden = orig_shape[-1]
    n_rows = 1
    for d in orig_shape[:-1]:
        n_rows *= d

    x2d = hidden_states.reshape(n_rows, hidden)
    w2d = weight.reshape(1, hidden)
    b2d = bias.reshape(1, hidden)

    itemsize = jnp.dtype(hidden_states.dtype).itemsize
    row_block, vmem_cap = _select_row_block(n_rows, hidden, itemsize)
    grid = (_cdiv(n_rows, row_block),)

    # Explicit VMEM budget: double-buffered in/out tiles + f32 intermediates.
    budget = (4 * row_block * hidden * itemsize        # 2x in + 2x out buffers
              + 4 * row_block * hidden * 4             # f32 upcast / temporaries
              + (2 << 20))                             # headroom
    vmem_limit = min(max(budget, 16 << 20), int(vmem_cap * 0.75))
    vmem_limit = min(max(vmem_limit, budget), int(vmem_cap * 0.85))

    param_itemsize = jnp.dtype(weight.dtype).itemsize
    cost = pl.CostEstimate(
        flops=int(8 * n_rows * hidden),
        transcendentals=int(n_rows),
        bytes_accessed=int(2 * n_rows * hidden * itemsize + 2 * hidden * param_itemsize),
    )

    out = pl.pallas_call(
        functools.partial(_layer_norm_kernel, eps=float(eps), inv_hidden=1.0 / float(hidden)),
        out_shape=jax.ShapeDtypeStruct((n_rows, hidden), hidden_states.dtype),
        grid_spec=pltpu.PrefetchScalarGridSpec(
            num_scalar_prefetch=0,
            grid=grid,
            in_specs=[
                pl.BlockSpec((row_block, hidden), lambda i: (i, 0)),  # rows tile
                pl.BlockSpec((1, hidden), lambda i: (0, 0)),          # weight (resident)
                pl.BlockSpec((1, hidden), lambda i: (0, 0)),          # bias   (resident)
            ],
            out_specs=pl.BlockSpec((row_block, hidden), lambda i: (i, 0)),
        ),
        compiler_params=pltpu.CompilerParams(
            dimension_semantics=("parallel",),   # independent row tiles -> megacore-shardable
            vmem_limit_bytes=int(vmem_limit),
        ),
        cost_estimate=cost,
    )(x2d, w2d, b2d)

    return out.reshape(orig_shape)


def _reference_ln(x, weight, bias, eps):
    xf = x.astype(jnp.float32)
    mean = jnp.mean(xf, axis=-1, keepdims=True)
    var = jnp.mean((xf - mean) ** 2, axis=-1, keepdims=True)
    return (xf - mean) * lax.rsqrt(var + eps) * weight.astype(jnp.float32) + bias.astype(jnp.float32)


if __name__ == "__main__":
    # Small deterministic setup consistent with the module (ln_f over [B, S, H]).
    BATCH, SEQ, HIDDEN = 2, 8, 128
    EPS = 1e-5

    key = jax.random.PRNGKey(0)
    k_x, k_w, k_b = jax.random.split(key, 3)

    hidden_states = jax.random.normal(k_x, (BATCH, SEQ, HIDDEN), dtype=jnp.float32)
    weight = jax.random.normal(k_w, (HIDDEN,), dtype=jnp.float32)
    bias = jax.random.normal(k_b, (HIDDEN,), dtype=jnp.float32)

    out = lnf_forward(hidden_states, weight, bias, eps=EPS)
    out = jax.block_until_ready(out)

    ref = _reference_ln(hidden_states, weight, bias, EPS)
    assert out.shape == (BATCH, SEQ, HIDDEN), out.shape
    assert out.dtype == jnp.float32, out.dtype
    max_err = float(jnp.max(jnp.abs(out - ref)))
    assert jnp.allclose(out, ref, atol=1e-5, rtol=1e-5), max_err

    # Secondary check: bf16 storage + ragged row count exercises the dtype-aware
    # sublane rounding / full-dim fallback and masked tail handling.
    hs_bf16 = hidden_states[:, :5, :].astype(jnp.bfloat16)
    out_bf16 = jax.block_until_ready(
        lnf_forward(hs_bf16, weight.astype(jnp.bfloat16), bias.astype(jnp.bfloat16), eps=EPS)
    )
    ref_bf16 = _reference_ln(hs_bf16, weight.astype(jnp.bfloat16), bias.astype(jnp.bfloat16), EPS)
    assert out_bf16.shape == (BATCH, 5, HIDDEN), out_bf16.shape
    assert out_bf16.dtype == jnp.bfloat16, out_bf16.dtype
    assert jnp.allclose(out_bf16.astype(jnp.float32), ref_bf16, atol=1e-1, rtol=1e-1)

    print("KERNEL_OK")
</pallas_src>

<mosaic_0001>
module attributes {stable_mosaic.version = 11 : i64} {
  func.func @_layer_norm_kernel(%arg0: i32, %arg1: memref<8x128xf32, #tpu.memory_space<vmem>>, %arg2: memref<1x128xf32, #tpu.memory_space<vmem>>, %arg3: memref<1x128xf32, #tpu.memory_space<vmem>>, %arg4: memref<8x128xf32, #tpu.memory_space<vmem>>) attributes {dimension_semantics = [#tpu.dimension_semantics<parallel>], iteration_bounds = array<i64: 2>, scalar_prefetch = 0 : i64, scratch_operands = 0 : i64, tpu.core_type = #tpu.core_type<tc>, window_params = [{transform_indices = @transform_0, window_bounds = array<i64: 8, 128>}, {pipeline_mode = #tpu.pipeline_mode<synchronous>, transform_indices = @transform_1, window_bounds = array<i64: 1, 128>}, {pipeline_mode = #tpu.pipeline_mode<synchronous>, transform_indices = @transform_2, window_bounds = array<i64: 1, 128>}, {transform_indices = @transform_3, window_bounds = array<i64: 8, 128>}]} {
    %c0 = arith.constant 0 : index
    %c0_0 = arith.constant 0 : index
    %0 = vector.load %arg1[%c0, %c0_0] : memref<8x128xf32, #tpu.memory_space<vmem>>, vector<8x128xf32>
    %cst = arith.constant dense<0.000000e+00> : vector<8xf32>
    %1 = vector.multi_reduction <add>, %0, %cst [1] : vector<8x128xf32> to vector<8xf32>
    %2 = vector.shape_cast %1 : vector<8xf32> to vector<8x1xf32>
    %3 = arith.mulf %0, %0 : vector<8x128xf32>
    %cst_1 = arith.constant dense<0.000000e+00> : vector<8xf32>
    %4 = vector.multi_reduction <add>, %3, %cst_1 [1] : vector<8x128xf32> to vector<8xf32>
    %5 = vector.shape_cast %4 : vector<8xf32> to vector<8x1xf32>
    %cst_2 = arith.constant 7.812500e-03 : f32
    %6 = vector.broadcast %cst_2 : f32 to vector<8x1xf32>
    %7 = arith.mulf %2, %6 : vector<8x1xf32>
    %cst_3 = arith.constant 7.812500e-03 : f32
    %8 = vector.broadcast %cst_3 : f32 to vector<8x1xf32>
    %9 = arith.mulf %5, %8 : vector<8x1xf32>
    %10 = arith.mulf %7, %7 : vector<8x1xf32>
    %11 = arith.subf %9, %10 : vector<8x1xf32>
    %cst_4 = arith.constant 0.000000e+00 : f32
    %12 = vector.broadcast %cst_4 : f32 to vector<8x1xf32>
    %13 = arith.maximumf %11, %12 : vector<8x1xf32>
    %cst_5 = arith.constant 9.99999974E-6 : f32
    %14 = vector.broadcast %cst_5 : f32 to vector<8x1xf32>
    %15 = arith.addf %13, %14 : vector<8x1xf32>
    %16 = math.rsqrt %15 : vector<8x1xf32>
    %c0_6 = arith.constant 0 : index
    %c0_7 = arith.constant 0 : index
    %17 = vector.load %arg2[%c0_6, %c0_7] : memref<1x128xf32, #tpu.memory_space<vmem>>, vector<1x128xf32>
    %c0_8 = arith.constant 0 : index
    %c0_9 = arith.constant 0 : index
    %18 = vector.load %arg3[%c0_8, %c0_9] : memref<1x128xf32, #tpu.memory_space<vmem>>, vector<1x128xf32>
    %19 = vector.broadcast %7 : vector<8x1xf32> to vector<8x128xf32>
    %20 = arith.subf %0, %19 : vector<8x128xf32>
    %21 = vector.broadcast %16 : vector<8x1xf32> to vector<8x128xf32>
    %22 = arith.mulf %20, %21 : vector<8x128xf32>
    %23 = vector.broadcast %17 : vector<1x128xf32> to vector<8x128xf32>
    %24 = arith.mulf %22, %23 : vector<8x128xf32>
    %25 = vector.broadcast %18 : vector<1x128xf32> to vector<8x128xf32>
    %26 = arith.addf %24, %25 : vector<8x128xf32>
    %c0_10 = arith.constant 0 : index
    %c0_11 = arith.constant 0 : index
    %27 = vector.load %arg4[%c0_10, %c0_11] : memref<8x128xf32, #tpu.memory_space<vmem>>, vector<8x128xf32>
    tpu.vector_store %arg4[%c0_10, %c0_11], %26 {strides = array<i32>} : memref<8x128xf32, #tpu.memory_space<vmem>>, vector<8x128xf32>,
    return
  }
  func.func @transform_0(%arg0: i32) -> (i32, i32) {
    %c0_i32 = arith.constant 0 : i32
    %c0_i32_0 = arith.constant 0 : i32
    return %arg0, %c0_i32 : i32, i32
  }
  func.func @transform_1(%arg0: i32) -> (i32, i32) {
    %c0_i32 = arith.constant 0 : i32
    %c0_i32_0 = arith.constant 0 : i32
    %c0_i32_1 = arith.constant 0 : i32
    return %c0_i32, %c0_i32_0 : i32, i32
  }
  func.func @transform_2(%arg0: i32) -> (i32, i32) {
    %c0_i32 = arith.constant 0 : i32
    %c0_i32_0 = arith.constant 0 : i32
    %c0_i32_1 = arith.constant 0 : i32
    return %c0_i32, %c0_i32_0 : i32, i32
  }
  func.func @transform_3(%arg0: i32) -> (i32, i32) {
    %c0_i32 = arith.constant 0 : i32
    %c0_i32_0 = arith.constant 0 : i32
    return %arg0, %c0_i32 : i32, i32
  }
}

</mosaic_0001>

<bundles_post_ra>
// kernel: lnf_forward.1
= control target key start
LH: loop header
LB: loop body
LE: loop exit
PB: predicated region body
PF: predicated region fallthrough
CT: control target
= control target key end

     0   :  { %8 = vsyncpa [#allocation3], 0  ;;  %s651_s0 = inlined_call_operand.hbm [shape: f32[16,128], index: 0, kind: input, shape index: {}]   ;;  %s652_s1 = inlined_call_operand.vmem [shape: f32[1,128], index: 1, kind: input, shape index: {}]   ;;  %s653_s2 = inlined_call_operand.vmem [shape: f32[1,128], index: 2, kind: input, shape index: {}]   ;;  %s654_s3 = inlined_call_operand.hbm [shape: f32[16,128], index: 3, kind: output, shape index: {}]  }
   0x1   :  { %10 = vsyncpa [#allocation3 + $0x1], 0 }
   0x2   :  { %11 = vsyncpa [#allocation4], 0 }
   0x3   :  { %13 = vsyncpa [#allocation4 + $0x1], 0  ;;  %s484_s12 = smov 0   ;;  %s486_s13 = smov 0  }
   0x4   :  { %s488_s14 = smov 0   ;;  %s490_s15 = smov 0  }
   0x5 LB: > { %s505_s16 = sadd.s32 4294967295, %s460_s15   ;;  %s302_s17 = sadd.s32 4294967294, %s460_s15   ;;  %s460_s15 = sphi %s490_s15, %s669_s15   ;;  %s456_s14 = sphi %s488_s14, %s668_s14   ;;  %s452_s13 = sphi %s486_s13, %s667_s13   ;;  %s448_s12 = sphi %s484_s12, %s666_s12  }
   0x6   : > { %s509_s18 = sadd.s32 1, %s460_s15   ;;  %s26_s19 = sadd.s32 1, %s456_s14 }
   0x7   : > { %s23_s20 = ssub.s32 %s460_s15, %s509_s18  ;;  %p33_p0 = scmp.ne.s32.totalorder %s456_s14, %s452_s13 }
   0x8   : > { %p24_p1 = scmp.eq.s32.totalorder %s23_s20, 0  ;;  %p34_p2 = scmp.eq.s32.totalorder %s460_s15, 0 }
   0x9   : > { %p39_p3 = scmp.ne.s32.totalorder %s452_s13, %s448_s12  ;;  %p40_p4 = scmp.eq.s32.totalorder %s505_s16, 0 }
   0xa   : > { %s521_s21 = scalar_select %p24_p1, %s456_s14, %s26_s19  }
   0xb   : > { %p523_p5 = por %p34_p2, %p33_p0  ;;  %p527_p6 = por %p40_p4, %p39_p3 }
   0xc   : > { %p105_p7 = scmp.eq.s32.totalorder %s505_s16, 1  ;;  %p111_p8 = scmp.eq.s32.totalorder %s302_s17, 1 }
   0xd   : > { %p328_p10 = scmp.lt.s32.totalorder %s460_s15, 2  ;;  %s137_s26 = sand.u32 1, %s456_s14  }
   0xe   : > { %p534_p11 = por %p105_p7, %p33_p0  ;;  %p538_p12 = por %p111_p8, %p39_p3 }
   0xf   : > { %s306_s27 = sshll.u32 %s460_s15, 7  ;;  %s305_s28 = sshll.u32 %s137_s26, 3 }
  0x10   : > { %s658_s24 = scalar_select %p534_p11, 1, 0 }
  0x11   : > { %s659_s25 = scalar_select %p538_p12, 1, 0 }
  0x12   : > { %s547_s4 = scalar_lea.hbm %s651_s0, %s306_s27  ;;  %s141_s5 = scalar_lea.vmem [#allocation2], %s305_s28 }
  0x13   : > { %s148_s6 = sshll.u32 %s141_s5, 4  ;;  %p551_p13 = pnand %p328_p10, %p523_p5  ;;  %s555_s6 = int_to_ptr.vmem [resolvable:$true] %s148_s6 }
  0x14   : > { %s138_s8 = scalar_lea.sflag [#allocation3], %s137_s26  ;;  %s364_s9 = scalar_lea.hbm %s547_s4, 128 }
  0x15   : > { %p365_p2 = scmp.ne.s32.totalorder %s547_s4, %s364_s9  ;;  %p366_p3 = pneg %p551_p13 }
  0x16   : > { %s369_s17 = scalar_lea.hbm %s651_s0, 256  ;;  %p370_p5 = scmp.lt.u32.totalorder %s547_s4, %s651_s0 }
  0x17   : > { %p367_p4 = pnand %p366_p3, %p365_p2  ;;  %p371_p8 = scmp.lt.u32.totalorder %s369_s17, %s364_s9 }
  0x18   : > { %p373_p9 = scmp.lt.u32.totalorder %s364_s9, %s547_s4 }
  0x19   : > { %p368_p7 = pneg %p367_p4  ;;  %p372_p10 = por %p371_p8, %p370_p5 }
  0x1b   : > { %p374_p0 = por %p373_p9, %p372_p10 }
  0x1d   : > { %p375_p1 = pnand %p374_p0, %p368_p7 }
  0x1f   : > { %378 = shalt.err (!%p375_p1)
}
  0x20   : > { %s379_s22 = scalar_lea.vmem %s555_s6, 128  ;;  %s462_s26 = smov [#allocation2]  }
  0x21   : > { %p380_p2 = scmp.ne.s32.totalorder %s555_s6, %s379_s22  ;;  %s384_s27 = sshll.u32 %s462_s26, 4  ;;  %s385_s27 = int_to_ptr.vmem [resolvable:$false] %s384_s27 }
  0x22   : > { %s386_s28 = scalar_lea.vmem %s385_s27, 256  ;;  %p387_p11 = scmp.lt.s32.totalorder %s555_s6, %s385_s27 }
  0x23   : > { %p382_p4 = pnand %p380_p2, %p366_p3  ;;  %p388_p5 = scmp.lt.s32.totalorder %s386_s28, %s379_s22 }
  0x25   : > { %p383_p12 = pneg %p382_p4  ;;  %p389_p8 = por %p388_p5, %p387_p11 }
  0x27   : > { %p390_p9 = pnand %p389_p8, %p383_p12 }
  0x29   : > { %393 = shalt.err (!%p390_p9)
}
  0x2a   : > { %323 = dma.hbm_to_vmem [thread:$0]  (!%p551_p13), %s547_s4, 128, %s555_s6, %s138_s8  }
  0x2b   : > { %p661_p0 = scmp.lt.s32.totalorder %s460_s15, 3  ;;  %p662_p1 = scmp.ge.s32.totalorder %s460_s15, 1 }
  0x2d   : > { %p154_p3 = pnand %p662_p1, %p661_p0 }
  0x2e   : > { %s589_s29 = sand.u32 (!%p154_p3), 1, %s452_s13  }
  0x2f   : > { %157 = sbr.rel (%p154_p3) target bundleno = 241 (0xf1), region = 32  ;;  %s308_s30 = sshll.u32 (!%p154_p3), %s589_s29, 3 }
  0x30   : > { %s160_s5 = scalar_lea.sflag (!%p154_p3), [#allocation3], %s589_s29  ;;  %s163_s9 = scalar_lea.vmem (!%p154_p3), [#allocation2], %s308_s30 }
  0x36   : > { %439 = dma.done.wait (%p527_p6), %s160_s5, 128  }
  0x37   : > { %441 = vsyncadd (%p527_p6), %s160_s5, 4294967168  ;;  %v186_v0 = vld [vmem:[%s163_s9] sm:$0xff]  ;;  %s313_s8 = sshll.u32 %s505_s16, 7  ;;  %s185_s10 = scalar_lea.vmem [#allocation5], %s308_s30 }
  0x38   : > { %187 = vadd.xlane.f32.xlu0 %v186_v0  ;;  %v189_v1 = vmul.f32 %v186_v0, %v186_v0  ;;  %v310_v12 = vld [vmem:[%s652_s1] ss:$0 sm:$0xff]  ;;  %s232_s11 = sshll.u32 %s185_s10, 4  ;;  %s607_s20 = scalar_lea.hbm %s654_s3, %s313_s8  ;;  %s609_s11 = int_to_ptr.vmem [resolvable:$true] %s232_s11 }
  0x39   : > { %v311_v14 = vld [vmem:[%s653_s2] ss:$0 sm:$0xff]  ;;  %s219_s22 = scalar_lea.sflag [#allocation4], %s589_s29  ;;  %s394_s26 = scalar_lea.vmem %s609_s11, 128 }
  0x3a   : > { %p395_p6 = scmp.ne.s32.totalorder %s609_s11, %s394_s26  ;;  %p663_p11 = scmp.ne.s32.totalorder %s658_s24, 0 }
  0x3b   : > { %s463_s16 = smov [#allocation5]  }
  0x3c   : > { %190 = vadd.xlane.f32.xlu0 %v189_v1  ;;  %p396_p12 = pnand %p395_p6, %p663_p11  ;;  %s398_s27 = sshll.u32 %s463_s16, 4  ;;  %s399_s27 = int_to_ptr.vmem [resolvable:$false] %s398_s27 }
  0x3d   : > { %s400_s28 = scalar_lea.vmem %s399_s27, 256  ;;  %p401_p7 = scmp.lt.s32.totalorder %s609_s11, %s399_s27 }
  0x3e   : > { %p397_p13 = pneg %p396_p12  ;;  %p402_p10 = scmp.lt.s32.totalorder %s400_s28, %s394_s26 }
  0x40   : > { %p403_p2 = por %p402_p10, %p401_p7 }
  0x42   : > { %p404_p4 = pnand %p403_p2, %p397_p13 }
  0xc5   : > { %v188_v2 = vpop.xlane.xlu0 %187 }
  0xc6   : > { %v192_v3 = vmul.f32 0.0078125, %v188_v2 }
  0xc8   : > { %v194_v5 = vmul.f32 %v192_v3, %v192_v3  ;;  %v201_v10 = vsub.f32 %v186_v0, %v192_v3 }
  0xc9   : > { %v191_v4 = vpop.xlane.xlu0 %190 }
  0xca   : > { %v193_v6 = vmul.f32 0.0078125, %v191_v4 }
  0xcc   : > { %v195_v7 = vsub.f32 %v193_v6, %v194_v5 }
  0xce   : > { %v196_v8 = vmax.f32 %v195_v7, 0.0 }
  0xd0   : > { %v197_v9 = vadd.f32 1e-05, %v196_v8 }
  0xd2   : > { %362 = vrsqrt.f32 %v197_v9 }
  0xdc   : > { %v363_v11 = vpop.eup %362 }
  0xdd   : > { %v202_v13 = vmul.f32 %v363_v11, %v201_v10 }
  0xdf   : > { %v209_v15 = vmul.f32 %v310_v12, %v202_v13 }
  0xe1   : > { %v216_v16 = vadd.f32 %v311_v14, %v209_v15 }
  0xe3   : > { %217 = vst [vmem:[%s185_s10] sm:$0xff] %v216_v16 }
  0xe4   : > { %407 = shalt.err (!%p404_p4)
}
  0xe5   : > { %s408_s29 = scalar_lea.hbm %s607_s20, 128  ;;  %s412_s9 = scalar_lea.hbm %s654_s3, 256 }
  0xe6   : > { %p409_p5 = scmp.ne.s32.totalorder %s607_s20, %s408_s29  ;;  %p413_p0 = scmp.lt.u32.totalorder %s607_s20, %s654_s3 }
  0xe7   : > { %p414_p1 = scmp.lt.u32.totalorder %s412_s9, %s408_s29  ;;  %p416_p6 = scmp.lt.u32.totalorder %s408_s29, %s607_s20 }
  0xe8   : > { %p410_p8 = pnand %p409_p5, %p663_p11 }
  0xe9   : > { %p415_p3 = por %p414_p1, %p413_p0 }
  0xea   : > { %p411_p9 = pneg %p410_p8 }
  0xeb   : > { %p417_p12 = por %p416_p6, %p415_p3 }
  0xed   : > { %p418_p13 = pnand %p417_p12, %p411_p9 }
  0xef   : > { %421 = shalt.err (!%p418_p13)
}
  0xf0   : > { %318 = dma.vmem_to_hbm [thread:$0]  (%p663_p11), %s609_s11, 128, %s607_s20, %s219_s22  }
  0xf1 PF: > { %s244_s6 = sand.u32 1, %s448_s12   ;;  %p664_p7 = scmp.ne.s32.totalorder %s659_s25, 0 }
  0xf2   : > { %p665_p10 = scmp.ge.s32.totalorder %s460_s15, 2  ;;  %s245_s7 = scalar_lea.sflag [#allocation4], %s244_s6 }
  0xf4   : > { %p325_p2 = pnand %p665_p10, %p664_p7 }
  0xf6   : > { %443 = dma.done.wait (!%p325_p2), %s245_s7, 128  }
  0xf7   : > { %445 = vsyncadd (!%p325_p2), %s245_s7, 4294967168  ;;  %p16_p4 = scmp.ge.s32.totalorder %s509_s18, 4   ;;  %s666_s12 = smov %s452_s13 }
  0xf8   : > { %s667_s13 = smov %s456_s14  ;;  %s668_s14 = smov %s521_s21 }
  0xf9   : > { %s669_s15 = smov %s509_s18  ;;  %18 = sbr.rel (!%p16_p4) target bundleno = 5 (0x5), region = 77 }
 0x100   :  { %250 = vsyncpa [#allocation3], 1 }
 0x101   :  { %252 = vsyncpa [#allocation3 + $0x1], 1 }
 0x102   :  { %253 = vsyncpa [#allocation4], 1 }
 0x103   :  { %255 = vsyncpa [#allocation4 + $0x1], 1 }

</bundles_post_ra>
